<compile_context>
chip_gen: v5e
topology: v5e:2x2
jax: 0.10.0
libtpu: 0.0.40
codegen_flags: <defaults>
</compile_context>

<pallas_src>
import functools

import jax
import jax.numpy as jnp
from jax.experimental import pallas as pl
from jax.experimental.pallas import tpu as pltpu

# layers = [in_dim, hidden, hidden, hidden, out_dim]  (depth = 4, tanh activation)
LAYERS = [2, 32, 32, 32, 1]


# --------------------------------------------------------------------------------------
# Kernel
# --------------------------------------------------------------------------------------
def _ddnn_kernel(x_ref, *refs):
    """refs = (w0, b0, w1, b1, ..., w_last, b_last, out_ref).

    w0/b0 are f32 (VPU layer); the remaining weights are bf16 (MXU operands),
    biases f32. Accumulation, bias add and tanh are all f32.
    """
    out_ref = refs[-1]
    param_refs = refs[:-1]
    n_layers = len(param_refs) // 2

    x = x_ref[...]                                     # [M, in_dim] f32

    # ---- layer 0: K = in_dim (tiny) -> VPU broadcast FMAs, normalisation pre-folded ----
    w0, b0 = param_refs[0], param_refs[1]              # [in_dim, 2H] f32, [1, 2H] f32
    in_dim = w0.shape[0]
    h = b0[...]                                        # broadcast over batch below
    for k in range(in_dim):                            # static, in_dim == 2
        h = h + x[:, k:k + 1] * w0[k:k + 1, :]
    h = jnp.tanh(h)                                    # [M, 2H] f32

    # ---- hidden layers: one block-diagonal bf16 [M,2H]@[2H,2H] MXU dot each ----
    for li in range(1, n_layers - 1):
        w, b = param_refs[2 * li], param_refs[2 * li + 1]   # bf16, f32
        z = jnp.dot(h.astype(jnp.bfloat16), w[...],
                    preferred_element_type=jnp.float32) + b[...]
        h = jnp.tanh(z)                                 # f32 tanh (v5e-safe)

    # ---- final layer (no activation): emits [out_u | out_v] directly ----
    w, b = param_refs[-2], param_refs[-1]               # [2H, 2*out] bf16, [1, 2*out] f32
    out_ref[...] = (jnp.dot(h.astype(jnp.bfloat16), w[...],
                            preferred_element_type=jnp.float32)
                    + b[...]).astype(out_ref.dtype)


# --------------------------------------------------------------------------------------
# Host-side packing + wrapper
# --------------------------------------------------------------------------------------
def _pack_params(lb, ub, params1, params2):
    """Pack the two independent real networks into block weights (f32).

    Layer 0:  W0p = [s*W1_0 | s*W2_0]  ([in_dim, 2H]),  b0p folds the -lb*s shift.
    Layer i:  Wp  = [[W1_i, 0], [0, W2_i]]  ([2H_in, 2H_out]),  bp = [b1_i | b2_i].
    """
    s = 1.0 / (ub - lb)                                          # [in_dim]

    (w1, b1), (w2, b2) = params1[0], params2[0]
    w0 = jnp.concatenate([w1, w2], axis=1)                       # [in_dim, 2H]
    b0 = jnp.concatenate([b1, b2], axis=1)                       # [1, 2H]
    w0f = s[:, None] * w0
    b0f = b0 - (lb * s)[None, :] @ w0
    packed = [(w0f, b0f)]

    for (wa, ba), (wb, bb) in zip(params1[1:], params2[1:]):
        za = jnp.zeros_like(wa)
        zb = jnp.zeros_like(wb)
        wblk = jnp.concatenate(
            [jnp.concatenate([wa, za], axis=1),
             jnp.concatenate([zb, wb], axis=1)], axis=0)          # [2*fin, 2*fout]
        bblk = jnp.concatenate([ba, bb], axis=1)                  # [1, 2*fout]
        packed.append((wblk, bblk))
    return packed


@functools.partial(jax.jit, static_argnames=("block_m",))
def ddnn_forward(x, lb, ub, params1, params2, *, block_m=2048):
    """Full DoubleRealVaulueDNN forward in one Pallas kernel.

    x: [N, in_dim] f32;  lb/ub: [in_dim] f32;
    params1/params2: lists of (W [fin,fout], b [1,fout]) for the two real MLPs.
    Returns [N, 2*out_dim] f32 = concat(out_u, out_v).
    """
    N, in_dim = x.shape
    out_dim = params1[-1][0].shape[1]
    packed = _pack_params(lb, ub, params1, params2)

    # ---- batch tiling ----
    # Sublane-align the tile (block (block_m, 2) needs block_m % 8 == 0 to lower).
    block_m = max(8, (int(block_m) // 8) * 8)
    n8 = ((N + 7) // 8) * 8
    if n8 >= 16:
        # Cap at ~half the padded batch so the grid has >= 2 steps: with
        # dimension_semantics=("parallel",) this lets both v7x TensorCores work
        # (no effect on single-TC v5e/v6e).  2048 keeps per-step overhead
        # amortised and the pipeline comfortably inside scoped VMEM everywhere.
        block_m = min(block_m, ((n8 + 15) // 16) * 8)
    else:
        block_m = min(block_m, n8)
    n_pad = pl.cdiv(N, block_m) * block_m
    if n_pad != N:
        x = jnp.pad(x, ((0, n_pad - N), (0, 0)))

    flat_params = []
    in_specs = [pl.BlockSpec((block_m, in_dim), lambda i: (i, 0))]   # x, tiled over batch
    for li, (w, b) in enumerate(packed):
        if li > 0:
            # Hidden/final weights as bf16 MXU operands (accumulation stays f32).
            w = w.astype(jnp.bfloat16)
        flat_params += [w, b]
        in_specs += [pl.BlockSpec(w.shape, lambda i: (0, 0)),        # weights resident
                     pl.BlockSpec(b.shape, lambda i: (0, 0))]

    out = pl.pallas_call(
        _ddnn_kernel,
        out_shape=jax.ShapeDtypeStruct((n_pad, 2 * out_dim), jnp.float32),
        grid=(n_pad // block_m,),
        in_specs=in_specs,
        out_specs=pl.BlockSpec((block_m, 2 * out_dim), lambda i: (i, 0)),
        compiler_params=pltpu.CompilerParams(dimension_semantics=("parallel",)),
    )(x, *flat_params)

    return out[:N]


# --------------------------------------------------------------------------------------
# Init + pure-JAX reference
# --------------------------------------------------------------------------------------
def init_params(key, layers):
    """PyTorch-Linear-style init: U(-1/sqrt(fan_in), 1/sqrt(fan_in)) for W and b."""
    params = []
    for fin, fout in zip(layers[:-1], layers[1:]):
        key, kw, kb = jax.random.split(key, 3)
        bound = 1.0 / float(jnp.sqrt(jnp.float32(fin)))
        w = jax.random.uniform(kw, (fin, fout), jnp.float32, -bound, bound)
        b = jax.random.uniform(kb, (1, fout), jnp.float32, -bound, bound)
        params.append((w, b))
    return params


def ddnn_reference(x, lb, ub, params1, params2):
    """Pure-JAX (f32) mirror of DoubleRealVaulueDNN.forward (tanh activation)."""
    xn = (x - lb[None, :]) / (ub - lb)[None, :]

    def mlp(h, params):
        for (w, b) in params[:-1]:
            h = jnp.tanh(h @ w + b)
        w, b = params[-1]
        return h @ w + b

    return jnp.concatenate([mlp(xn, params1), mlp(xn, params2)], axis=-1)


# --------------------------------------------------------------------------------------
if __name__ == "__main__":
    key = jax.random.PRNGKey(0)
    k_x, k_p1, k_p2 = jax.random.split(key, 3)

    in_dim = LAYERS[0]
    lb = jnp.array([-1.0, 0.0], dtype=jnp.float32)   # low_point
    ub = jnp.array([1.0, 1.0], dtype=jnp.float32)    # max_point

    N = 300                                          # ragged batch (exercises padding)
    x = lb + (ub - lb) * jax.random.uniform(k_x, (N, in_dim), jnp.float32)

    params1 = init_params(k_p1, LAYERS)              # self.layers1
    params2 = init_params(k_p2, LAYERS)              # self.layers2

    ref = ddnn_reference(x, lb, ub, params1, params2)

    # Default block_m: capped to ~half the padded batch -> >=2 grid steps (v7x megacore).
    out = jax.block_until_ready(ddnn_forward(x, lb, ub, params1, params2))
    assert out.shape == (N, 2 * LAYERS[-1])
    # bf16 MXU operands (f32 accumulate) -> tolerance loosened vs the f32 reference.
    assert jnp.allclose(out, ref, atol=5e-2, rtol=5e-2), float(jnp.max(jnp.abs(out - ref)))

    # Non-multiple-of-8 block_m: exercises the rounding fix + a multi-step grid.
    out2 = jax.block_until_ready(ddnn_forward(x, lb, ub, params1, params2, block_m=100))
    assert jnp.allclose(out2, ref, atol=5e-2, rtol=5e-2), float(jnp.max(jnp.abs(out2 - ref)))

    print("KERNEL_OK")
</pallas_src>

<mosaic_0001>
module attributes {stable_mosaic.version = 11 : i64} {
  func.func @_ddnn_kernel(%arg0: i32, %arg1: memref<152x2xf32, #tpu.memory_space<vmem>>, %arg2: memref<2x64xf32, #tpu.memory_space<vmem>>, %arg3: memref<1x64xf32, #tpu.memory_space<vmem>>, %arg4: memref<64x64xbf16, #tpu.memory_space<vmem>>, %arg5: memref<1x64xf32, #tpu.memory_space<vmem>>, %arg6: memref<64x64xbf16, #tpu.memory_space<vmem>>, %arg7: memref<1x64xf32, #tpu.memory_space<vmem>>, %arg8: memref<64x2xbf16, #tpu.memory_space<vmem>>, %arg9: memref<1x2xf32, #tpu.memory_space<vmem>>, %arg10: memref<152x2xf32, #tpu.memory_space<vmem>>) attributes {dimension_semantics = [#tpu.dimension_semantics<parallel>], iteration_bounds = array<i64: 2>, scalar_prefetch = 0 : i64, scratch_operands = 0 : i64, tpu.core_type = #tpu.core_type<tc>, window_params = [{transform_indices = @transform_0, window_bounds = array<i64: 152, 2>}, {pipeline_mode = #tpu.pipeline_mode<synchronous>, transform_indices = @transform_1, window_bounds = array<i64: 2, 64>}, {pipeline_mode = #tpu.pipeline_mode<synchronous>, transform_indices = @transform_2, window_bounds = array<i64: 1, 64>}, {pipeline_mode = #tpu.pipeline_mode<synchronous>, transform_indices = @transform_3, window_bounds = array<i64: 64, 64>}, {pipeline_mode = #tpu.pipeline_mode<synchronous>, transform_indices = @transform_4, window_bounds = array<i64: 1, 64>}, {pipeline_mode = #tpu.pipeline_mode<synchronous>, transform_indices = @transform_5, window_bounds = array<i64: 64, 64>}, {pipeline_mode = #tpu.pipeline_mode<synchronous>, transform_indices = @transform_6, window_bounds = array<i64: 1, 64>}, {pipeline_mode = #tpu.pipeline_mode<synchronous>, transform_indices = @transform_7, window_bounds = array<i64: 64, 2>}, {pipeline_mode = #tpu.pipeline_mode<synchronous>, transform_indices = @transform_8, window_bounds = array<i64: 1, 2>}, {transform_indices = @transform_9, window_bounds = array<i64: 152, 2>}]} {
    %c0 = arith.constant 0 : index
    %c0_0 = arith.constant 0 : index
    %0 = vector.load %arg1[%c0, %c0_0] : memref<152x2xf32, #tpu.memory_space<vmem>>, vector<152x2xf32>
    %c0_1 = arith.constant 0 : index
    %c0_2 = arith.constant 0 : index
    %1 = vector.load %arg3[%c0_1, %c0_2] : memref<1x64xf32, #tpu.memory_space<vmem>>, vector<1x64xf32>
    %2 = vector.extract_strided_slice %0 {offsets = [0, 0], sizes = [152, 1], strides = [1, 1]} : vector<152x2xf32> to vector<152x1xf32>
    %c0_3 = arith.constant 0 : index
    %c0_4 = arith.constant 0 : index
    %3 = vector.load %arg2[%c0_3, %c0_4] : memref<2x64xf32, #tpu.memory_space<vmem>>, vector<1x64xf32>
    %4 = vector.broadcast %2 : vector<152x1xf32> to vector<152x64xf32>
    %5 = vector.broadcast %3 : vector<1x64xf32> to vector<152x64xf32>
    %6 = arith.mulf %4, %5 : vector<152x64xf32>
    %7 = vector.broadcast %1 : vector<1x64xf32> to vector<152x64xf32>
    %8 = arith.addf %7, %6 : vector<152x64xf32>
    %9 = vector.extract_strided_slice %0 {offsets = [0, 1], sizes = [152, 1], strides = [1, 1]} : vector<152x2xf32> to vector<152x1xf32>
    %c1 = arith.constant 1 : index
    %c0_5 = arith.constant 0 : index
    %10 = vector.load %arg2[%c1, %c0_5] : memref<2x64xf32, #tpu.memory_space<vmem>>, vector<1x64xf32>
    %11 = vector.broadcast %9 : vector<152x1xf32> to vector<152x64xf32>
    %12 = vector.broadcast %10 : vector<1x64xf32> to vector<152x64xf32>
    %13 = arith.mulf %11, %12 : vector<152x64xf32>
    %14 = arith.addf %8, %13 : vector<152x64xf32>
    %15 = math.tanh %14 : vector<152x64xf32>
    %16 = arith.truncf %15 : vector<152x64xf32> to vector<152x64xbf16>
    %c0_6 = arith.constant 0 : index
    %c0_7 = arith.constant 0 : index
    %17 = vector.load %arg4[%c0_6, %c0_7] : memref<64x64xbf16, #tpu.memory_space<vmem>>, vector<64x64xbf16>
    %cst = arith.constant dense<0.000000e+00> : vector<152x64xf32>
    %18 = tpu.matmul %16, %17, %cst {dimension_numbers = #tpu.dot_dimension_numbers<[1], [0], [0], [1], [0, 0, 1, 1], [], []>} : vector<152x64xbf16>, vector<64x64xbf16>, vector<152x64xf32> -> vector<152x64xf32>
    %c0_8 = arith.constant 0 : index
    %c0_9 = arith.constant 0 : index
    %19 = vector.load %arg5[%c0_8, %c0_9] : memref<1x64xf32, #tpu.memory_space<vmem>>, vector<1x64xf32>
    %20 = vector.broadcast %19 : vector<1x64xf32> to vector<152x64xf32>
    %21 = arith.addf %18, %20 : vector<152x64xf32>
    %22 = math.tanh %21 : vector<152x64xf32>
    %23 = arith.truncf %22 : vector<152x64xf32> to vector<152x64xbf16>
    %c0_10 = arith.constant 0 : index
    %c0_11 = arith.constant 0 : index
    %24 = vector.load %arg6[%c0_10, %c0_11] : memref<64x64xbf16, #tpu.memory_space<vmem>>, vector<64x64xbf16>
    %cst_12 = arith.constant dense<0.000000e+00> : vector<152x64xf32>
    %25 = tpu.matmul %23, %24, %cst_12 {dimension_numbers = #tpu.dot_dimension_numbers<[1], [0], [0], [1], [0, 0, 1, 1], [], []>} : vector<152x64xbf16>, vector<64x64xbf16>, vector<152x64xf32> -> vector<152x64xf32>
    %c0_13 = arith.constant 0 : index
    %c0_14 = arith.constant 0 : index
    %26 = vector.load %arg7[%c0_13, %c0_14] : memref<1x64xf32, #tpu.memory_space<vmem>>, vector<1x64xf32>
    %27 = vector.broadcast %26 : vector<1x64xf32> to vector<152x64xf32>
    %28 = arith.addf %25, %27 : vector<152x64xf32>
    %29 = math.tanh %28 : vector<152x64xf32>
    %30 = arith.truncf %29 : vector<152x64xf32> to vector<152x64xbf16>
    %c0_15 = arith.constant 0 : index
    %c0_16 = arith.constant 0 : index
    %31 = vector.load %arg8[%c0_15, %c0_16] : memref<64x2xbf16, #tpu.memory_space<vmem>>, vector<64x2xbf16>
    %cst_17 = arith.constant dense<0.000000e+00> : vector<152x2xf32>
    %32 = tpu.matmul %30, %31, %cst_17 {dimension_numbers = #tpu.dot_dimension_numbers<[1], [0], [0], [1], [0, 0, 1, 1], [], []>} : vector<152x64xbf16>, vector<64x2xbf16>, vector<152x2xf32> -> vector<152x2xf32>
    %c0_18 = arith.constant 0 : index
    %c0_19 = arith.constant 0 : index
    %33 = vector.load %arg9[%c0_18, %c0_19] : memref<1x2xf32, #tpu.memory_space<vmem>>, vector<1x2xf32>
    %34 = vector.broadcast %33 : vector<1x2xf32> to vector<152x2xf32>
    %35 = arith.addf %32, %34 : vector<152x2xf32>
    %c0_20 = arith.constant 0 : index
    %c0_21 = arith.constant 0 : index
    %36 = vector.load %arg10[%c0_20, %c0_21] : memref<152x2xf32, #tpu.memory_space<vmem>>, vector<152x2xf32>
    tpu.vector_store %arg10[%c0_20, %c0_21], %35 {strides = array<i32>} : memref<152x2xf32, #tpu.memory_space<vmem>>, vector<152x2xf32>,
    return
  }
  func.func @transform_0(%arg0: i32) -> (i32, i32) {
    %c0_i32 = arith.constant 0 : i32
    %c0_i32_0 = arith.constant 0 : i32
    return %arg0, %c0_i32 : i32, i32
  }
  func.func @transform_1(%arg0: i32) -> (i32, i32) {
    %c0_i32 = arith.constant 0 : i32
    %c0_i32_0 = arith.constant 0 : i32
    %c0_i32_1 = arith.constant 0 : i32
    return %c0_i32, %c0_i32_0 : i32, i32
  }
  func.func @transform_2(%arg0: i32) -> (i32, i32) {
    %c0_i32 = arith.constant 0 : i32
    %c0_i32_0 = arith.constant 0 : i32
    %c0_i32_1 = arith.constant 0 : i32
    return %c0_i32, %c0_i32_0 : i32, i32
  }
  func.func @transform_3(%arg0: i32) -> (i32, i32) {
    %c0_i32 = arith.constant 0 : i32
    %c0_i32_0 = arith.constant 0 : i32
    %c0_i32_1 = arith.constant 0 : i32
    return %c0_i32, %c0_i32_0 : i32, i32
  }
  func.func @transform_4(%arg0: i32) -> (i32, i32) {
    %c0_i32 = arith.constant 0 : i32
    %c0_i32_0 = arith.constant 0 : i32
    %c0_i32_1 = arith.constant 0 : i32
    return %c0_i32, %c0_i32_0 : i32, i32
  }
  func.func @transform_5(%arg0: i32) -> (i32, i32) {
    %c0_i32 = arith.constant 0 : i32
    %c0_i32_0 = arith.constant 0 : i32
    %c0_i32_1 = arith.constant 0 : i32
    return %c0_i32, %c0_i32_0 : i32, i32
  }
  func.func @transform_6(%arg0: i32) -> (i32, i32) {
    %c0_i32 = arith.constant 0 : i32
    %c0_i32_0 = arith.constant 0 : i32
    %c0_i32_1 = arith.constant 0 : i32
    return %c0_i32, %c0_i32_0 : i32, i32
  }
  func.func @transform_7(%arg0: i32) -> (i32, i32) {
    %c0_i32 = arith.constant 0 : i32
    %c0_i32_0 = arith.constant 0 : i32
    %c0_i32_1 = arith.constant 0 : i32
    return %c0_i32, %c0_i32_0 : i32, i32
  }
  func.func @transform_8(%arg0: i32) -> (i32, i32) {
    %c0_i32 = arith.constant 0 : i32
    %c0_i32_0 = arith.constant 0 : i32
    %c0_i32_1 = arith.constant 0 : i32
    return %c0_i32, %c0_i32_0 : i32, i32
  }
  func.func @transform_9(%arg0: i32) -> (i32, i32) {
    %c0_i32 = arith.constant 0 : i32
    %c0_i32_0 = arith.constant 0 : i32
    return %arg0, %c0_i32 : i32, i32
  }
}

</mosaic_0001>

<bundles_post_ra>
// kernel: ddnn_forward.1
= control target key start
LH: loop header
LB: loop body
LE: loop exit
PB: predicated region body
PF: predicated region fallthrough
CT: control target
= control target key end

     0   :  { %s1470_s30 = smov 0   ;;  %s1766_s0 = inlined_call_operand.vmem [shape: f32[304,2], index: 0, kind: input, shape index: {}]   ;;  %s1767_s1 = inlined_call_operand.vmem [shape: f32[2,64], index: 1, kind: input, shape index: {}]   ;;  %s1768_s2 = inlined_call_operand.vmem [shape: f32[1,64], index: 2, kind: input, shape index: {}]   ;;  %s1769_s3 = inlined_call_operand.vmem [shape: bf16[64,64], index: 3, kind: input, shape index: {}]   ;;  %s1770_s4 = inlined_call_operand.vmem [shape: f32[1,64], index: 4, kind: input, shape index: {}]   ;;  %s1771_s5 = inlined_call_operand.vmem [shape: bf16[64,64], index: 5, kind: input, shape index: {}]   ;;  %s1772_s6 = inlined_call_operand.vmem [shape: f32[1,64], index: 6, kind: input, shape index: {}]   ;;  %s1773_s7 = inlined_call_operand.vmem [shape: bf16[64,2], index: 7, kind: input, shape index: {}]   ;;  %s1774_s8 = inlined_call_operand.vmem [shape: f32[1,2], index: 8, kind: input, shape index: {}]   ;;  %s1775_s9 = inlined_call_operand.vmem [shape: f32[304,2], index: 9, kind: output, shape index: {}]  }
   0x1 LB: > { %s1147_s10 = sadd.s32 4294967295, %s1416_s30   ;;  %p1151_p0 = scmp.ge.s32.totalorder %s1416_s30, 1  ;;  %s1416_s30 = sphi %s1470_s30, %s19_s30  }
   0x2   : > { %p288_p1 = scmp.lt.s32.totalorder %s1416_s30, 3 }
   0x4   : > { %p289_p2 = pnand %p1151_p0, %p288_p1 }
   0x5   : > { %s324_s11 = smul.u32 (!%p289_p2), 19, %s1147_s10 }
   0x6   : > { %292 = sbr.rel (%p289_p2) target bundleno = 698 (0x2ba), region = 56 }
   0x7   : > { %p325_p3 = scmp.lt.s32.totalorder (!%p289_p2), %s324_s11, 37 }
   0xb   : > { %v1418_v0 = vmov 1   ;;  %v1419_v1 = vmov 0   ;;  %s1777_s11 = smov (!%p325_p3, %s324_s11), 37  ;;  %v1237_v19 = vld [vmem:[%s1769_s3 + $0x18] sm:$0xff]  ;;  %v1236_v20 = vld [vmem:[%s1769_s3 + $0x10] sm:$0xff]  ;;  %v1235_v23 = vld [vmem:[%s1769_s3 + $0x8] sm:$0xff] }
   0xc   : > { %1269 = vset.pattern.permute.xlu1 %v1418_v0  ;;  %1268 = vset.pattern.permute.xlu0 %v1419_v1  ;;  %s1152_s12 = sshll.u32 %s1777_s11, 3  ;;  %v1234_v24 = vld [vmem:[%s1769_s3] sm:$0xff]  ;;  %vm676_vm0 = vcmask 523264   ;;  %vm1071_vm1 = vcmask 15360  }
   0xd   : > { %1270 = vset.pattern.permute.xlu2 %v1419_v1  ;;  %s1489_s15 = scalar_lea.vmem %s1766_s0, %s1152_s12  ;;  %711 = vmatpush.bf16.msra.mxu0 %v1237_v19  ;;  %v1544_v27 = vld [vmem:[%s1767_s1] ss:$0 sm:$0xff]  ;;  %v1554_v31 = vld [vmem:[%s1767_s1 + $0x1] ss:$0 sm:$0xff]  ;;  %s1723_s18 = scalar_lea.vmem %s1775_s9, %s1152_s12 }
   0xe   : > { %v337_v2 = vld [vmem:[%s1489_s15] sm:$0xff]  ;;  %v339_v3 = vld [vmem:[%s1489_s15 + $0x10] sm:$0xff]  ;;  %v338_v4 = vld [vmem:[%s1489_s15 + $0x8] sm:$0xff]  ;;  %1246 = vmatpush.bf16.msra.mxu3 %v1237_v19 }
   0xf   : > { %497 = vperm.xlu1 %1269, %v337_v2   ;;  %360 = vperm.xlu0 %1268, %v337_v2   ;;  %v340_v5 = vld [vmem:[%s1489_s15 + $0x18] sm:$0xff]  ;;  %v341_v6 = vld [vmem:[%s1489_s15 + $0x20] sm:$0xff]  ;;  %v342_v7 = vld [vmem:[%s1489_s15 + $0x28] sm:$0xff] }
  0x10   : > { %370 = vperm.xlu2 %1270, %v339_v3   ;;  %v343_v8 = vld [vmem:[%s1489_s15 + $0x30] sm:$0xff]  ;;  %v344_v9 = vld [vmem:[%s1489_s15 + $0x38] sm:$0xff]  ;;  %v346_v10 = vld [vmem:[%s1489_s15 + $0x48] sm:$0xff] }
  0x11   : > { %v345_v11 = vld [vmem:[%s1489_s15 + $0x40] sm:$0xff]  ;;  %v347_v12 = vld [vmem:[%s1489_s15 + $0x50] sm:$0xff]  ;;  %v354_v13 = vld [vmem:[%s1489_s15 + $0x88] sm:$0xff]  ;;  %712 = vmatpush.bf16.msra.mxu0 %v1236_v20 }
  0x12   : > { %v348_v14 = vld [vmem:[%s1489_s15 + $0x58] sm:$0xff]  ;;  %v349_v15 = vld [vmem:[%s1489_s15 + $0x60] sm:$0xff]  ;;  %v350_v18 = vld [vmem:[%s1489_s15 + $0x68] sm:$0xff]  ;;  %1247 = vmatpush.bf16.msra.mxu3 %v1236_v20 }
  0x13   : > { %v353_v16 = vld [vmem:[%s1489_s15 + $0x80] sm:$0xff]  ;;  %v352_v17 = vld [vmem:[%s1489_s15 + $0x78] sm:$0xff]  ;;  %v351_v21 = vld [vmem:[%s1489_s15 + $0x70] sm:$0xff] }
  0x14   : > { %v355_v26 = vld [vmem:[%s1489_s15 + $0x90] sm:$0xff]  ;;  %v1549_v30 = vld [vmem:[%s1768_s2] ss:$0 sm:$0xff] }
  0x15   : > { %713 = vmatpush.bf16.msra.mxu0 %v1235_v23 }
  0x16   : > { %1248 = vmatpush.bf16.msra.mxu3 %v1235_v23 }
  0x17   : > { %501 = vperm.xlu1 %1269, %v338_v4   ;;  %365 = vperm.xlu0 %1268, %v338_v4  }
  0x18   : > { %375 = vperm.xlu2 %1270, %v340_v5  }
  0x19   : > { %714 = vmatpush.bf16.msra.mxu0 %v1234_v24 }
  0x1a   : > { %1249 = vmatpush.bf16.msra.mxu3 %v1234_v24 }
  0x1f   : > { %509 = vperm.xlu1 %1269, %v340_v5   ;;  %1271 = vset.pattern.permute.xlu0 %v1418_v0 }
  0x20   : > { %505 = vperm.xlu0 %1271, %v339_v3   ;;  %380 = vperm.xlu2 %1270, %v341_v6  }
  0x27   : > { %1272 = vset.pattern.permute.xlu1 %v1419_v1 }
  0x28   : > { %385 = vperm.xlu1 %1272, %v342_v7   ;;  %517 = vperm.xlu0 %1271, %v342_v7  }
  0x29   : > { %1273 = vset.pattern.permute.xlu2 %v1418_v0 }
  0x2a   : > { %513 = vperm.xlu2 %1273, %v341_v6  }
  0x30   : > { %390 = vperm.xlu1 %1272, %v343_v8   ;;  %521 = vperm.xlu0 %1271, %v343_v8  }
  0x32   : > { %1274 = vset.pattern.permute.xlu2 %v1419_v1 }
  0x33   : > { %395 = vperm.xlu2 %1274, %v344_v9  }
  0x38   : > { %1275 = vset.pattern.permute.xlu1 %v1418_v0  ;;  %1276 = vset.pattern.permute.xlu0 %v1419_v1 }
  0x39   : > { %525 = vperm.xlu1 %1275, %v344_v9   ;;  %405 = vperm.xlu0 %1276, %v346_v10  }
  0x3b   : > { %400 = vperm.xlu2 %1274, %v345_v11  }
  0x41   : > { %529 = vperm.xlu1 %1275, %v345_v11   ;;  %1280 = vset.pattern.permute.xlu0 %v1418_v0 }
  0x42   : > { %537 = vperm.xlu0 %1280, %v347_v12  }
  0x43   : > { %1277 = vset.pattern.permute.xlu2 %v1418_v0 }
  0x44   : > { %533 = vperm.xlu2 %1277, %v346_v10  }
  0x49   : > { %1278 = vset.pattern.permute.xlu1 %v1419_v1 }
  0x4a   : > { %410 = vperm.xlu1 %1278, %v347_v12   ;;  %565 = vperm.xlu0 %1280, %v354_v13  }
  0x4c   : > { %1279 = vset.pattern.permute.xlu2 %v1419_v1 }
  0x4d   : > { %415 = vperm.xlu2 %1279, %v348_v14  }
  0x52   : > { %1281 = vset.pattern.permute.xlu1 %v1418_v0  ;;  %545 = vperm.xlu0 %1280, %v349_v15  }
  0x53   : > { %541 = vperm.xlu1 %1281, %v348_v14  }
  0x55   : > { %440 = vperm.xlu2 %1279, %v353_v16  }
  0x5a   : > { %1286 = vset.pattern.permute.xlu0 %v1419_v1 }
  0x5b   : > { %1282 = vset.pattern.permute.xlu1 %v1419_v1  ;;  %435 = vperm.xlu0 %1286, %v352_v17  }
  0x5c   : > { %445 = vperm.xlu1 %1282, %v354_v13  }
  0x5d   : > { %1283 = vset.pattern.permute.xlu2 %v1418_v0 }
  0x5e   : > { %561 = vperm.xlu2 %1283, %v353_v16  }
  0x63   : > { %1289 = vset.pattern.permute.xlu0 %v1418_v0 }
  0x64   : > { %420 = vperm.xlu1 %1282, %v349_v15  }
  0x66   : > { %1284 = vset.pattern.permute.xlu2 %v1419_v1 }
  0x67   : > { %425 = vperm.xlu2 %1284, %v350_v18  }
  0x6a   : > { %v371_v22 = vpop.permute.xlu2 %370 }
  0x6b   : > { %v456_v46 = vmul.f32 %v1544_v27, %v371_v22 }
  0x6c   : > { %1285 = vset.pattern.permute.xlu1 %v1418_v0 }
  0x6d   : > { %549 = vperm.xlu1 %1285, %v350_v18   ;;  %v478_v52 = vadd.f32 %v1549_v30, %v456_v46 }
  0x6f   : > { %430 = vperm.xlu2 %1284, %v351_v21  }
  0x72   : > { %v376_v25 = vpop.permute.xlu2 %375 }
  0x73   : > { %v457_v44 = vmul.f32 %v1544_v27, %v376_v25 }
  0x75   : > { %553 = vperm.xlu1 %1285, %v351_v21   ;;  %v479_v49 = vadd.f32 %v1549_v30, %v457_v44 }
  0x77   : > { %1287 = vset.pattern.permute.xlu2 %v1418_v0 }
  0x78   : > { %557 = vperm.xlu2 %1287, %v352_v17  }
  0x7a   : > { %v381_v33 = vpop.permute.xlu2 %380 }
  0x7d   : > { %1288 = vset.pattern.permute.xlu1 %v1419_v1  ;;  %v458_v1 = vmul.f32 %v1544_v27, %v381_v33 }
  0x7e   : > { %450 = vperm.xlu1 %1288, %v355_v26  }
  0x7f   : > { %v480_v5 = vadd.f32 %v1549_v30, %v458_v1 }
  0x80   : > { %569 = vperm.xlu2 %1287, %v355_v26  }
  0x81   : > { %v498_v28 = vpop.permute.xlu1 %497  ;;  %v361_v29 = vpop.permute.xlu0 %360 }
  0x82   : > { %v454_v32 = vmul.f32 %v1544_v27, %v361_v29  ;;  %v573_v34 = vmul.f32 %v1554_v31, %v498_v28 }
  0x84   : > { %v476_v35 = vadd.f32 %v1549_v30, %v454_v32  ;;  %v514_v43 = vpop.permute.xlu2 %513 }
  0x85   : > { %v577_v6 = vmul.f32 %v1554_v31, %v514_v43 }
  0x86   : > { %v592_v39 = vadd.f32 %v573_v34, %v476_v35 }
  0x87   : > { %v596_v10 = vadd.f32 %v577_v6, %v480_v5 }
  0x88   : > { %1296 = vtanh.f32 %v592_v39 }
  0x89   : > { %v502_v36 = vpop.permute.xlu1 %501  ;;  %v366_v37 = vpop.permute.xlu0 %365 }
  0x8a   : > { %v455_v38 = vmul.f32 %v1544_v27, %v366_v37  ;;  %v574_v40 = vmul.f32 %v1554_v31, %v502_v36 }
  0x8c   : > { %v477_v41 = vadd.f32 %v1549_v30, %v455_v38 }
  0x8d   : > { %v396_v54 = vpop.permute.xlu2 %395 }
  0x8e   : > { %v593_v42 = vadd.f32 %v574_v40, %v477_v41  ;;  %v1297_v48 = vpop.eup %1296  ;;  %v461_v12 = vmul.f32 %v1544_v27, %v396_v54 }
  0x90   : > { %1298 = vtanh.f32 %v593_v42  ;;  %v483_v18 = vadd.f32 %v1549_v30, %v461_v12 }
  0x91   : > { %v510_v45 = vpop.permute.xlu1 %509 }
  0x92   : > { %v506_v47 = vpop.permute.xlu0 %505  ;;  %v576_v50 = vmul.f32 %v1554_v31, %v510_v45 }
  0x93   : > { %v575_v53 = vmul.f32 %v1554_v31, %v506_v47 }
  0x94   : > { %v595_v56 = vadd.f32 %v576_v50, %v479_v49 }
  0x95   : > { %v594_v57 = vadd.f32 %v575_v53, %v478_v52  ;;  %v401_v59 = vpop.permute.xlu2 %400 }
  0x96   : > { %v1299_v51 = vpop.eup %1298  ;;  %1300 = vtanh.f32 %v595_v56  ;;  %v462_v32 = vmul.f32 %v1544_v27, %v401_v59 }
  0x97   : > { %v630_v55 = vpack.c.bf16 %v1299_v51, %v1297_v48  ;;  %1302 = vtanh.f32 %v594_v57 }
  0x98   : > { %v484_v39 = vadd.f32 %v1549_v30, %v462_v32 }
  0x99   : > { %1170 = vmatmul.msk.bf16.vlgmr.msra.gmra.mxu0 %vm676_vm0, %v630_v55 }
  0x9a   : > { %v386_v58 = vpop.permute.xlu1 %385  ;;  %v518_v63 = vpop.permute.xlu0 %517 }
  0x9b   : > { %v459_v60 = vmul.f32 %v1544_v27, %v386_v58  ;;  %v578_v3 = vmul.f32 %v1554_v31, %v518_v63 }
  0x9c   : > { %v1301_v62 = vpop.eup %1300 }
  0x9d   : > { %v1303_v0 = vpop.eup %1302  ;;  %v481_v2 = vadd.f32 %v1549_v30, %v459_v60 }
  0x9e   : > { %v631_v4 = vpack.c.bf16 %v1301_v62, %v1303_v0  ;;  %v534_v8 = vpop.permute.xlu2 %533 }
  0x9f   : > { %v597_v7 = vadd.f32 %v578_v3, %v481_v2  ;;  %v582_v36 = vmul.f32 %v1554_v31, %v534_v8 }
  0xa1   : > { %1304 = vtanh.f32 %v597_v7 }
  0xa2   : > { %v391_v61 = vpop.permute.xlu1 %390  ;;  %1306 = vtanh.f32 %v596_v10  ;;  %v522_v11 = vpop.permute.xlu0 %521 }
  0xa3   : > { %v460_v15 = vmul.f32 %v1544_v27, %v391_v61  ;;  %v579_v22 = vmul.f32 %v1554_v31, %v522_v11 }
  0xa5   : > { %v482_v21 = vadd.f32 %v1549_v30, %v460_v15 }
  0xa7   : > { %v1305_v14 = vpop.eup %1304  ;;  %v416_v16 = vpop.permute.xlu2 %415  ;;  %v598_v25 = vadd.f32 %v579_v22, %v482_v21 }
  0xa8   : > { %v1307_v17 = vpop.eup %1306  ;;  %v465_v56 = vmul.f32 %v1544_v27, %v416_v16 }
  0xa9   : > { %1171 = vmatmul.msk.bf16.gmra.mxu0 %vm676_vm0, %v631_v4  ;;  %v632_v20 = vpack.c.bf16 %v1305_v14, %v1307_v17 }
  0xaa   : > { %v487_v62 = vadd.f32 %v1549_v30, %v465_v56 }
  0xab   : > { %v526_v9 = vpop.permute.xlu1 %525  ;;  %v406_v24 = vpop.permute.xlu0 %405 }
  0xac   : > { %v580_v19 = vmul.f32 %v1554_v31, %v526_v9  ;;  %v463_v29 = vmul.f32 %v1544_v27, %v406_v24 }
  0xae   : > { %v599_v23 = vadd.f32 %v580_v19, %v483_v18  ;;  %v485_v35 = vadd.f32 %v1549_v30, %v463_v29 }
  0xaf   : > { %v441_v28 = vpop.permute.xlu2 %440 }
  0xb0   : > { %1308 = vtanh.f32 %v599_v23  ;;  %v470_v41 = vmul.f32 %v1544_v27, %v441_v28  ;;  %v601_v44 = vadd.f32 %v582_v36, %v485_v35 }
  0xb1   : > { %1310 = vtanh.f32 %v598_v25 }
  0xb2   : > { %v492_v46 = vadd.f32 %v1549_v30, %v470_v41  ;;  %1312 = vtanh.f32 %v601_v44 }
  0xb3   : > { %v530_v13 = vpop.permute.xlu1 %529 }
  0xb4   : > { %v538_v33 = vpop.permute.xlu0 %537  ;;  %v581_v40 = vmul.f32 %v1554_v31, %v530_v13 }
  0xb5   : > { %v583_v61 = vmul.f32 %v1554_v31, %v538_v33 }
  0xb6   : > { %v1309_v34 = vpop.eup %1308  ;;  %v600_v45 = vadd.f32 %v581_v40, %v484_v39 }
  0xb7   : > { %v1311_v38 = vpop.eup %1310 }
  0xb8   : > { %v633_v42 = vpack.c.bf16 %v1309_v34, %v1311_v38  ;;  %v562_v43 = vpop.permute.xlu2 %561  ;;  %1314 = vtanh.f32 %v600_v45  ;;  %v1313_v57 = vpop.eup %1312  ;;  %v1239_v45 = vld [vmem:[%s1771_s5 + $0x8] sm:$0xff] }
  0xb9   : > { %1172 = vmatmul.msk.bf16.gmra.mxu0 %vm676_vm0, %v632_v20  ;;  %v589_v47 = vmul.f32 %v1554_v31, %v562_v43 }
  0xbb   : > { %v608_v51 = vadd.f32 %v589_v47, %v492_v46 }
  0xbc   : > { %v411_v26 = vpop.permute.xlu1 %410  ;;  %v566_v48 = vpop.permute.xlu0 %565 }
  0xbd   : > { %v590_v52 = vmul.f32 %v1554_v31, %v566_v48  ;;  %v464_v54 = vmul.f32 %v1544_v27, %v411_v26  ;;  %1316 = vtanh.f32 %v608_v51  ;;  %v1238_v48 = vld [vmem:[%s1771_s5] sm:$0xff] }
  0xbe   : > { %v1315_v59 = vpop.eup %1314  ;;  %v1638_v51 = vld [vmem:[%s1770_s4] ss:$0 sm:$0xff] }
  0xbf   : > { %v486_v60 = vadd.f32 %v1549_v30, %v464_v54  ;;  %v634_v1 = vpack.c.bf16 %v1313_v57, %v1315_v59 }
  0xc1   : > { %v426_v53 = vpop.permute.xlu2 %425  ;;  %v602_v3 = vadd.f32 %v583_v61, %v486_v60 }
  0xc2   : > { %v467_v9 = vmul.f32 %v1544_v27, %v426_v53 }
  0xc3   : > { %v1317_v2 = vpop.eup %1316 }
  0xc4   : > { %v546_v14 = vpop.permute.xlu0 %545  ;;  %v489_v15 = vadd.f32 %v1549_v30, %v467_v9 }
  0xc5   : > { %v542_v37 = vpop.permute.xlu1 %541  ;;  %v585_v20 = vmul.f32 %v1554_v31, %v546_v14 }
  0xc6   : > { %v584_v63 = vmul.f32 %v1554_v31, %v542_v37 }
  0xc8   : > { %v603_v4 = vadd.f32 %v584_v63, %v487_v62 }
  0xc9   : > { %1173 = vmatmul.msk.bf16.gmra.mxu0 %vm676_vm0, %v633_v42  ;;  %v431_v5 = vpop.permute.xlu2 %430 }
  0xca   : > { %v468_v32 = vmul.f32 %v1544_v27, %v431_v5 }
  0xcc   : > { %v490_v39 = vadd.f32 %v1549_v30, %v468_v32 }
  0xcd   : > { %v436_v23 = vpop.permute.xlu0 %435 }
  0xce   : > { %v446_v49 = vpop.permute.xlu1 %445  ;;  %v469_v26 = vmul.f32 %v1544_v27, %v436_v23 }
  0xcf   : > { %v471_v50 = vmul.f32 %v1544_v27, %v446_v49 }
  0xd0   : > { %v491_v35 = vadd.f32 %v1549_v30, %v469_v26 }
  0xd1   : > { %v493_v55 = vadd.f32 %v1549_v30, %v471_v50 }
  0xd2   : > { %v558_v13 = vpop.permute.xlu2 %557 }
  0xd3   : > { %v609_v58 = vadd.f32 %v590_v52, %v493_v55  ;;  %v588_v36 = vmul.f32 %v1554_v31, %v558_v13 }
  0xd5   : > { %1318 = vtanh.f32 %v609_v58  ;;  %v607_v42 = vadd.f32 %v588_v36, %v491_v35 }
  0xd6   : > { %v421_v0 = vpop.permute.xlu1 %420  ;;  %1320 = vtanh.f32 %v602_v3 }
  0xd7   : > { %1322 = vtanh.f32 %v603_v4  ;;  %v466_v12 = vmul.f32 %v1544_v27, %v421_v0 }
  0xd9   : > { %1174 = vmatmul.msk.bf16.gmra.mxu0 %vm676_vm0, %v634_v1  ;;  %v488_v19 = vadd.f32 %v1549_v30, %v466_v12 }
  0xda   : > { %v570_v24 = vpop.permute.xlu2 %569 }
  0xdb   : > { %v1319_v6 = vpop.eup %1318  ;;  %v604_v22 = vadd.f32 %v585_v20, %v488_v19  ;;  %v591_v29 = vmul.f32 %v1554_v31, %v570_v24 }
  0xdc   : > { %v638_v7 = vpack.c.bf16 %v1319_v6, %v1317_v2  ;;  %v1321_v10 = vpop.eup %1320 }
  0xdd   : > { %v1323_v11 = vpop.eup %1322 }
  0xde   : > { %1178 = vmatmul.msk.bf16.vlgmr.msra.gmra.mxu3 %vm676_vm0, %v638_v7  ;;  %v635_v18 = vpack.c.bf16 %v1323_v11, %v1321_v10 }
  0xdf   : > { %v550_v8 = vpop.permute.xlu1 %549 }
  0xe0   : > { %v586_v16 = vmul.f32 %v1554_v31, %v550_v8 }
  0xe2   : > { %v605_v21 = vadd.f32 %v586_v16, %v489_v15 }
  0xe4   : > { %1324 = vtanh.f32 %v605_v21 }
  0xe5   : > { %1326 = vtanh.f32 %v604_v22 }
  0xe7   : > { %v554_v17 = vpop.permute.xlu1 %553 }
  0xe8   : > { %v587_v40 = vmul.f32 %v1554_v31, %v554_v17 }
  0xe9   : > { %1175 = vmatmul.msk.bf16.gmra.mxu0 %vm676_vm0, %v635_v18 }
  0xea   : > { %v1325_v34 = vpop.eup %1324  ;;  %v606_v43 = vadd.f32 %v587_v40, %v490_v39 }
  0xeb   : > { %v1327_v38 = vpop.eup %1326 }
  0xec   : > { %v636_v41 = vpack.c.bf16 %v1325_v34, %v1327_v38 }
  0xf0   : > { %v451_v25 = vpop.permute.xlu1 %450 }
  0xf1   : > { %v472_v28 = vmul.f32 %v1544_v27, %v451_v25  ;;  %v1241_v27 = vld [vmem:[%s1771_s5 + $0x18] sm:$0xff] }
  0xf2   : > { %864 = vmatpush.bf16.msra.mxu1 %v1241_v27  ;;  %1250 = vmatpush.bf16.msrb.mxu3 %v1241_v27 }
  0xf3   : > { %v494_v33 = vadd.f32 %v1549_v30, %v472_v28  ;;  %v1240_v30 = vld [vmem:[%s1771_s5 + $0x10] sm:$0xff] }
  0xf5   : > { %v610_v37 = vadd.f32 %v591_v29, %v494_v33 }
  0xf6   : > { %865 = vmatpush.bf16.msra.mxu1 %v1240_v30  ;;  %1251 = vmatpush.bf16.msrb.mxu3 %v1240_v30 }
  0xf7   : > { %1328 = vtanh.f32 %v610_v37 }
  0xf8   : > { %1330 = vtanh.f32 %v607_v42 }
  0xf9   : > { %1176 = vmatmul.msk.bf16.gmra.mxu0 %vm676_vm0, %v636_v41  ;;  %1332 = vtanh.f32 %v606_v43 }
  0xfa   : > { %866 = vmatpush.bf16.msra.mxu1 %v1239_v45  ;;  %1252 = vmatpush.bf16.msrb.mxu3 %v1239_v45 }
  0xfd   : > { %v1329_v44 = vpop.eup %1328 }
  0xfe   : > { %v639_v31 = vpack.c.bf16 %v1329_v44, %v1329_v44  ;;  %v1331_v46 = vpop.eup %1330  ;;  %867 = vmatpush.bf16.msra.mxu1 %v1238_v48  ;;  %1253 = vmatpush.bf16.msrb.mxu3 %v1238_v48 }
  0xff   : > { %v1333_v47 = vpop.eup %1332 }
 0x100   : > { %1179 = vmatmul.msk.bf16.gmra.mxu3 %vm676_vm0, %v639_v31  ;;  %v637_v49 = vpack.c.bf16 %v1331_v46, %v1333_v47  ;;  %v1245_v46 = vld [vmem:[%s1773_s7 + $0x18] sm:$0xff] }
 0x101   : > { %1017 = vmatpush.bf16.msra.mxu2 %v1245_v46 }
 0x102   : > { %1254 = vmatpush.bf16.msra.mxu3 %v1245_v46 }
 0x109   : > { %1177 = vmatmul.msk.bf16.gmra.mxu0 %vm676_vm0, %v637_v49 }
 0x116   : > { %v716_v50 = vpop.f32.mrf.mxu0 }
 0x117   : > { %v717_v52 = vadd.f32 %v1638_v51, %v716_v50 }
 0x119   : > { %1334 = vtanh.f32 %v717_v52 }
 0x11e   : > { %v718_v53 = vpop.f32.mrf.mxu0 }
 0x11f   : > { %v719_v54 = vadd.f32 %v1638_v51, %v718_v53  ;;  %v1335_v55 = vpop.eup %1334  ;;  %v1244_v53 = vld [vmem:[%s1773_s7 + $0x10] sm:$0xff] }
 0x120   : > { %1018 = vmatpush.bf16.msra.mxu2 %v1244_v53  ;;  %1255 = vmatpush.bf16.msra.mxu3 %v1244_v53 }
 0x121   : > { %1336 = vtanh.f32 %v719_v54 }
 0x126   : > { %v721_v56 = vpop.f32.mrf.mxu0 }
 0x127   : > { %v1337_v57 = vpop.eup %1336  ;;  %v722_v59 = vadd.f32 %v1638_v51, %v721_v56 }
 0x128   : > { %v784_v58 = vpack.c.bf16 %v1337_v57, %v1335_v55  ;;  %v1243_v55 = vld [vmem:[%s1773_s7 + $0x8] sm:$0xff]  ;;  %v1242_v57 = vld [vmem:[%s1773_s7] sm:$0xff] }
 0x129   : > { %1338 = vtanh.f32 %v722_v59  ;;  %1019 = vmatpush.bf16.msra.mxu2 %v1243_v55  ;;  %1256 = vmatpush.bf16.msra.mxu3 %v1243_v55 }
 0x12a   : > { %1196 = vmatmul.msk.bf16.vlgmr.msra.gmra.mxu1 %vm676_vm0, %v784_v58 }
 0x12d   : > { %1020 = vmatpush.bf16.msra.mxu2 %v1242_v57  ;;  %1257 = vmatpush.bf16.msra.mxu3 %v1242_v57 }
 0x12e   : > { %v723_v60 = vpop.f32.mrf.mxu0 }
 0x12f   : > { %v724_v61 = vadd.f32 %v1638_v51, %v723_v60  ;;  %v1339_v62 = vpop.eup %1338  ;;  %v1684_v60 = vld [vmem:[%s1772_s6] ss:$0 sm:$0xff] }
 0x131   : > { %1340 = vtanh.f32 %v724_v61 }
 0x136   : > { %v726_v63 = vpop.f32.mrf.mxu0 }
 0x137   : > { %v1341_v0 = vpop.eup %1340  ;;  %v727_v2 = vadd.f32 %v1638_v51, %v726_v63 }
 0x138   : > { %v785_v1 = vpack.c.bf16 %v1341_v0, %v1339_v62 }
 0x139   : > { %1342 = vtanh.f32 %v727_v2 }
 0x13a   : > { %1197 = vmatmul.msk.bf16.gmra.mxu1 %vm676_vm0, %v785_v1 }
 0x13e   : > { %v728_v3 = vpop.f32.mrf.mxu0 }
 0x13f   : > { %v729_v4 = vadd.f32 %v1638_v51, %v728_v3  ;;  %v1343_v5 = vpop.eup %1342 }
 0x141   : > { %1344 = vtanh.f32 %v729_v4 }
 0x146   : > { %v731_v6 = vpop.f32.mrf.mxu0 }
 0x147   : > { %v1345_v7 = vpop.eup %1344  ;;  %v732_v9 = vadd.f32 %v1638_v51, %v731_v6 }
 0x148   : > { %v786_v8 = vpack.c.bf16 %v1345_v7, %v1343_v5 }
 0x149   : > { %1346 = vtanh.f32 %v732_v9 }
 0x14a   : > { %1198 = vmatmul.msk.bf16.gmra.mxu1 %vm676_vm0, %v786_v8 }
 0x14e   : > { %v733_v10 = vpop.f32.mrf.mxu0 }
 0x14f   : > { %v734_v11 = vadd.f32 %v1638_v51, %v733_v10  ;;  %v1347_v12 = vpop.eup %1346 }
 0x151   : > { %1348 = vtanh.f32 %v734_v11 }
 0x156   : > { %v736_v13 = vpop.f32.mrf.mxu0 }
 0x157   : > { %v1349_v14 = vpop.eup %1348  ;;  %v737_v16 = vadd.f32 %v1638_v51, %v736_v13 }
 0x158   : > { %v787_v15 = vpack.c.bf16 %v1349_v14, %v1347_v12 }
 0x159   : > { %1350 = vtanh.f32 %v737_v16 }
 0x15a   : > { %1199 = vmatmul.msk.bf16.gmra.mxu1 %vm676_vm0, %v787_v15 }
 0x15e   : > { %v738_v17 = vpop.f32.mrf.mxu0 }
 0x15f   : > { %v739_v18 = vadd.f32 %v1638_v51, %v738_v17  ;;  %v1351_v20 = vpop.eup %1350 }
 0x161   : > { %1352 = vtanh.f32 %v739_v18  ;;  %v756_v19 = vpop.f32.mrf.mxu3 }
 0x162   : > { %v757_v23 = vadd.f32 %v1638_v51, %v756_v19 }
 0x164   : > { %1354 = vtanh.f32 %v757_v23 }
 0x166   : > { %v741_v21 = vpop.f32.mrf.mxu0 }
 0x167   : > { %v1353_v22 = vpop.eup %1352  ;;  %v742_v28 = vadd.f32 %v1638_v51, %v741_v21 }
 0x168   : > { %v788_v24 = vpack.c.bf16 %v1353_v22, %v1351_v20 }
 0x169   : > { %v758_v25 = vpop.f32.mrf.mxu3 }
 0x16a   : > { %v759_v26 = vadd.f32 %v1638_v51, %v758_v25  ;;  %1200 = vmatmul.msk.bf16.gmra.mxu1 %vm676_vm0, %v788_v24  ;;  %v1355_v33 = vpop.eup %1354 }
 0x16c   : > { %1356 = vtanh.f32 %v759_v26 }
 0x16d   : > { %1358 = vtanh.f32 %v742_v28 }
 0x16e   : > { %v743_v29 = vpop.f32.mrf.mxu0 }
 0x16f   : > { %v744_v32 = vadd.f32 %v1638_v51, %v743_v29 }
 0x171   : > { %1360 = vtanh.f32 %v744_v32 }
 0x172   : > { %v1357_v34 = vpop.eup %1356 }
 0x173   : > { %v792_v35 = vpack.c.bf16 %v1357_v34, %v1355_v33  ;;  %v1359_v36 = vpop.eup %1358 }
 0x175   : > { %1204 = vmatmul.msk.bf16.vlgmr.msrb.gmra.mxu3 %vm676_vm0, %v792_v35 }
 0x176   : > { %v746_v37 = vpop.f32.mrf.mxu0 }
 0x177   : > { %v1361_v38 = vpop.eup %1360  ;;  %v747_v40 = vadd.f32 %v1638_v51, %v746_v37 }
 0x178   : > { %v789_v39 = vpack.c.bf16 %v1361_v38, %v1359_v36 }
 0x179   : > { %1362 = vtanh.f32 %v747_v40 }
 0x17a   : > { %1201 = vmatmul.msk.bf16.gmra.mxu1 %vm676_vm0, %v789_v39 }
 0x17e   : > { %v748_v41 = vpop.f32.mrf.mxu0 }
 0x17f   : > { %v749_v42 = vadd.f32 %v1638_v51, %v748_v41  ;;  %v1363_v44 = vpop.eup %1362 }
 0x181   : > { %1364 = vtanh.f32 %v749_v42 }
 0x183   : > { %v761_v27 = vpop.f32.mrf.mxu3 }
 0x184   : > { %v762_v43 = vadd.f32 %v1638_v51, %v761_v27 }
 0x186   : > { %1366 = vtanh.f32 %v762_v43  ;;  %v751_v30 = vpop.f32.mrf.mxu0 }
 0x187   : > { %v1365_v31 = vpop.eup %1364  ;;  %v752_v49 = vadd.f32 %v1638_v51, %v751_v30 }
 0x188   : > { %v790_v45 = vpack.c.bf16 %v1365_v31, %v1363_v44 }
 0x189   : > { %1368 = vtanh.f32 %v752_v49 }
 0x18a   : > { %1202 = vmatmul.msk.bf16.gmra.mxu1 %vm676_vm0, %v790_v45 }
 0x18b   : > { %v763_v47 = vpop.f32.mrf.mxu3 }
 0x18c   : > { %v1367_v48 = vpop.eup %1366 }
 0x18d   : > { %v793_v50 = vpack.c.bf16 %v1367_v48, %v1367_v48 }
 0x18e   : > { %v753_v52 = vpop.f32.mrf.mxu0 }
 0x18f   : > { %v754_v54 = vadd.f32 %v1638_v51, %v753_v52  ;;  %1205 = vmatmul.msk.bf16.gmra.mxu3 %vm676_vm0, %v793_v50  ;;  %v1369_v56 = vpop.eup %1368 }
 0x191   : > { %1370 = vtanh.f32 %v754_v54 }
 0x197   : > { %v1371_v58 = vpop.eup %1370 }
 0x198   : > { %v791_v59 = vpack.c.bf16 %v1371_v58, %v1369_v56 }
 0x19a   : > { %1203 = vmatmul.msk.bf16.gmra.mxu1 %vm676_vm0, %v791_v59 }
 0x1a7   : > { %v869_v51 = vpop.f32.mrf.mxu1 }
 0x1a8   : > { %v870_v61 = vadd.f32 %v1684_v60, %v869_v51 }
 0x1aa   : > { %1372 = vtanh.f32 %v870_v61 }
 0x1af   : > { %v871_v62 = vpop.f32.mrf.mxu1 }
 0x1b0   : > { %v872_v63 = vadd.f32 %v1684_v60, %v871_v62  ;;  %v1373_v0 = vpop.eup %1372 }
 0x1b2   : > { %1374 = vtanh.f32 %v872_v63 }
 0x1b7   : > { %v874_v1 = vpop.f32.mrf.mxu1 }
 0x1b8   : > { %v1375_v2 = vpop.eup %1374  ;;  %v875_v4 = vadd.f32 %v1684_v60, %v874_v1  ;;  %v1295_v1 = vld [vmem:[%s1774_s8] ss:$0 sm:$0xff] }
 0x1b9   : > { %v937_v3 = vpack.c.bf16 %v1375_v2, %v1373_v0 }
 0x1ba   : > { %1376 = vtanh.f32 %v875_v4 }
 0x1bb   : > { %1222 = vmatmul.msk.bf16.vlgmr.msra.gmra.mxu2 %vm676_vm0, %v937_v3 }
 0x1bf   : > { %v876_v5 = vpop.f32.mrf.mxu1 }
 0x1c0   : > { %v877_v6 = vadd.f32 %v1684_v60, %v876_v5  ;;  %v1377_v7 = vpop.eup %1376 }
 0x1c2   : > { %1378 = vtanh.f32 %v877_v6 }
 0x1c7   : > { %v879_v8 = vpop.f32.mrf.mxu1 }
 0x1c8   : > { %v1379_v9 = vpop.eup %1378  ;;  %v880_v11 = vadd.f32 %v1684_v60, %v879_v8 }
 0x1c9   : > { %v938_v10 = vpack.c.bf16 %v1379_v9, %v1377_v7 }
 0x1ca   : > { %1380 = vtanh.f32 %v880_v11 }
 0x1cb   : > { %1223 = vmatmul.msk.bf16.gmra.mxu2 %vm676_vm0, %v938_v10 }
 0x1cf   : > { %v881_v12 = vpop.f32.mrf.mxu1 }
 0x1d0   : > { %v882_v13 = vadd.f32 %v1684_v60, %v881_v12  ;;  %v1381_v14 = vpop.eup %1380 }
 0x1d2   : > { %1382 = vtanh.f32 %v882_v13 }
 0x1d7   : > { %v884_v15 = vpop.f32.mrf.mxu1 }
 0x1d8   : > { %v1383_v16 = vpop.eup %1382  ;;  %v885_v18 = vadd.f32 %v1684_v60, %v884_v15 }
 0x1d9   : > { %v939_v17 = vpack.c.bf16 %v1383_v16, %v1381_v14 }
 0x1da   : > { %1384 = vtanh.f32 %v885_v18 }
 0x1db   : > { %1224 = vmatmul.msk.bf16.gmra.mxu2 %vm676_vm0, %v939_v17 }
 0x1df   : > { %v886_v19 = vpop.f32.mrf.mxu1 }
 0x1e0   : > { %v887_v20 = vadd.f32 %v1684_v60, %v886_v19  ;;  %v1385_v21 = vpop.eup %1384 }
 0x1e2   : > { %1386 = vtanh.f32 %v887_v20 }
 0x1e7   : > { %v889_v22 = vpop.f32.mrf.mxu1 }
 0x1e8   : > { %v1387_v23 = vpop.eup %1386  ;;  %v890_v25 = vadd.f32 %v1684_v60, %v889_v22 }
 0x1e9   : > { %v940_v24 = vpack.c.bf16 %v1387_v23, %v1385_v21 }
 0x1ea   : > { %1388 = vtanh.f32 %v890_v25 }
 0x1eb   : > { %1225 = vmatmul.msk.bf16.gmra.mxu2 %vm676_vm0, %v940_v24 }
 0x1ef   : > { %v891_v26 = vpop.f32.mrf.mxu1 }
 0x1f0   : > { %v892_v28 = vadd.f32 %v1684_v60, %v891_v26  ;;  %v1389_v29 = vpop.eup %1388 }
 0x1f2   : > { %1390 = vtanh.f32 %v892_v28 }
 0x1f7   : > { %v894_v32 = vpop.f32.mrf.mxu1 }
 0x1f8   : > { %v1391_v33 = vpop.eup %1390  ;;  %v909_v34 = vpop.f32.mrf.mxu3  ;;  %v895_v36 = vadd.f32 %v1684_v60, %v894_v32 }
 0x1f9   : > { %v941_v35 = vpack.c.bf16 %v1391_v33, %v1389_v29  ;;  %v910_v37 = vadd.f32 %v1684_v60, %v909_v34 }
 0x1fa   : > { %1392 = vtanh.f32 %v895_v36 }
 0x1fb   : > { %1226 = vmatmul.msk.bf16.gmra.mxu2 %vm676_vm0, %v941_v35  ;;  %1394 = vtanh.f32 %v910_v37 }
 0x1ff   : > { %v896_v38 = vpop.f32.mrf.mxu1 }
 0x200   : > { %v897_v39 = vadd.f32 %v1684_v60, %v896_v38  ;;  %v911_v40 = vpop.f32.mrf.mxu3  ;;  %v1393_v42 = vpop.eup %1392 }
 0x201   : > { %v912_v41 = vadd.f32 %v1684_v60, %v911_v40  ;;  %v1395_v27 = vpop.eup %1394 }
 0x202   : > { %1396 = vtanh.f32 %v897_v39 }
 0x203   : > { %1398 = vtanh.f32 %v912_v41 }
 0x207   : > { %v899_v43 = vpop.f32.mrf.mxu1 }
 0x208   : > { %v1397_v44 = vpop.eup %1396  ;;  %v900_v46 = vadd.f32 %v1684_v60, %v899_v43 }
 0x209   : > { %v1399_v30 = vpop.eup %1398  ;;  %v942_v31 = vpack.c.bf16 %v1397_v44, %v1393_v42 }
 0x20a   : > { %v945_v45 = vpack.c.bf16 %v1399_v30, %v1395_v27  ;;  %1400 = vtanh.f32 %v900_v46 }
 0x20b   : > { %1227 = vmatmul.msk.bf16.gmra.mxu2 %vm676_vm0, %v942_v31 }
 0x20c   : > { %1230 = vmatmul.msk.bf16.vlgmr.msra.gmra.mxu3 %vm676_vm0, %v945_v45 }
 0x20f   : > { %v901_v47 = vpop.f32.mrf.mxu1 }
 0x210   : > { %v902_v48 = vadd.f32 %v1684_v60, %v901_v47  ;;  %v1401_v52 = vpop.eup %1400 }
 0x212   : > { %1402 = vtanh.f32 %v902_v48  ;;  %v914_v49 = vpop.f32.mrf.mxu3 }
 0x213   : > { %v915_v50 = vadd.f32 %v1684_v60, %v914_v49 }
 0x215   : > { %1404 = vtanh.f32 %v915_v50 }
 0x217   : > { %v904_v53 = vpop.f32.mrf.mxu1 }
 0x218   : > { %v1403_v54 = vpop.eup %1402  ;;  %v905_v59 = vadd.f32 %v1684_v60, %v904_v53 }
 0x219   : > { %v943_v55 = vpack.c.bf16 %v1403_v54, %v1401_v52 }
 0x21a   : > { %v916_v56 = vpop.f32.mrf.mxu3  ;;  %1406 = vtanh.f32 %v905_v59 }
 0x21b   : > { %v1405_v57 = vpop.eup %1404  ;;  %1228 = vmatmul.msk.bf16.gmra.mxu2 %vm676_vm0, %v943_v55 }
 0x21c   : > { %v946_v58 = vpack.c.bf16 %v1405_v57, %v1405_v57 }
 0x21e   : > { %1231 = vmatmul.msk.bf16.gmra.mxu3 %vm676_vm0, %v946_v58 }
 0x21f   : > { %v906_v51 = vpop.f32.mrf.mxu1 }
 0x220   : > { %v907_v61 = vadd.f32 %v1684_v60, %v906_v51  ;;  %v1407_v62 = vpop.eup %1406 }
 0x222   : > { %1408 = vtanh.f32 %v907_v61 }
 0x228   : > { %v1409_v63 = vpop.eup %1408 }
 0x229   : > { %v944_v0 = vpack.c.bf16 %v1409_v63, %v1407_v62 }
 0x22b   : > { %1229 = vmatmul.msk.bf16.gmra.mxu2 %vm676_vm0, %v944_v0 }
 0x23e   : > { %v1022_v60 = vpop.f32.mrf.mxu2 }
 0x23f   : > { %v1023_v2 = vadd.f32 %v1295_v1, %v1022_v60 }
 0x241   : > { %1072 = vst.msk [vmem:[%s1723_s18] sm:$0xff] %vm1071_vm1, %v1023_v2 }
 0x246   : > { %v1024_v3 = vpop.f32.mrf.mxu2 }
 0x247   : > { %v1025_v4 = vadd.f32 %v1295_v1, %v1024_v3 }
 0x249   : > { %1073 = vst.msk [vmem:[%s1723_s18 + $0x8] sm:$0xff] %vm1071_vm1, %v1025_v4 }
 0x24e   : > { %v1027_v5 = vpop.f32.mrf.mxu2 }
 0x24f   : > { %v1028_v6 = vadd.f32 %v1295_v1, %v1027_v5 }
 0x251   : > { %1074 = vst.msk [vmem:[%s1723_s18 + $0x10] sm:$0xff] %vm1071_vm1, %v1028_v6 }
 0x256   : > { %v1029_v7 = vpop.f32.mrf.mxu2 }
 0x257   : > { %v1030_v8 = vadd.f32 %v1295_v1, %v1029_v7 }
 0x259   : > { %1075 = vst.msk [vmem:[%s1723_s18 + $0x18] sm:$0xff] %vm1071_vm1, %v1030_v8 }
 0x25e   : > { %v1032_v9 = vpop.f32.mrf.mxu2 }
 0x25f   : > { %v1033_v10 = vadd.f32 %v1295_v1, %v1032_v9 }
 0x261   : > { %1076 = vst.msk [vmem:[%s1723_s18 + $0x20] sm:$0xff] %vm1071_vm1, %v1033_v10 }
 0x266   : > { %v1034_v11 = vpop.f32.mrf.mxu2 }
 0x267   : > { %v1035_v12 = vadd.f32 %v1295_v1, %v1034_v11 }
 0x269   : > { %1077 = vst.msk [vmem:[%s1723_s18 + $0x28] sm:$0xff] %vm1071_vm1, %v1035_v12 }
 0x26e   : > { %v1037_v13 = vpop.f32.mrf.mxu2 }
 0x26f   : > { %v1038_v14 = vadd.f32 %v1295_v1, %v1037_v13 }
 0x271   : > { %1078 = vst.msk [vmem:[%s1723_s18 + $0x30] sm:$0xff] %vm1071_vm1, %v1038_v14 }
 0x276   : > { %v1039_v15 = vpop.f32.mrf.mxu2 }
 0x277   : > { %v1040_v16 = vadd.f32 %v1295_v1, %v1039_v15 }
 0x279   : > { %1079 = vst.msk [vmem:[%s1723_s18 + $0x38] sm:$0xff] %vm1071_vm1, %v1040_v16 }
 0x27e   : > { %v1042_v17 = vpop.f32.mrf.mxu2 }
 0x27f   : > { %v1043_v18 = vadd.f32 %v1295_v1, %v1042_v17 }
 0x281   : > { %1080 = vst.msk [vmem:[%s1723_s18 + $0x40] sm:$0xff] %vm1071_vm1, %v1043_v18 }
 0x286   : > { %v1044_v19 = vpop.f32.mrf.mxu2 }
 0x287   : > { %v1045_v20 = vadd.f32 %v1295_v1, %v1044_v19 }
 0x289   : > { %1081 = vst.msk [vmem:[%s1723_s18 + $0x48] sm:$0xff] %vm1071_vm1, %v1045_v20 }
 0x28e   : > { %v1047_v21 = vpop.f32.mrf.mxu2 }
 0x28f   : > { %v1048_v22 = vadd.f32 %v1295_v1, %v1047_v21  ;;  %v1062_v23 = vpop.f32.mrf.mxu3 }
 0x290   : > { %v1063_v24 = vadd.f32 %v1295_v1, %v1062_v23 }
 0x291   : > { %1082 = vst.msk [vmem:[%s1723_s18 + $0x50] sm:$0xff] %vm1071_vm1, %v1048_v22 }
 0x292   : > { %1088 = vst.msk [vmem:[%s1723_s18 + $0x80] sm:$0xff] %vm1071_vm1, %v1063_v24 }
 0x296   : > { %v1049_v25 = vpop.f32.mrf.mxu2 }
 0x297   : > { %v1050_v26 = vadd.f32 %v1295_v1, %v1049_v25  ;;  %v1064_v28 = vpop.f32.mrf.mxu3 }
 0x298   : > { %v1065_v29 = vadd.f32 %v1295_v1, %v1064_v28 }
 0x299   : > { %1083 = vst.msk [vmem:[%s1723_s18 + $0x58] sm:$0xff] %vm1071_vm1, %v1050_v26 }
 0x29a   : > { %1089 = vst.msk [vmem:[%s1723_s18 + $0x88] sm:$0xff] %vm1071_vm1, %v1065_v29 }
 0x29e   : > { %v1052_v32 = vpop.f32.mrf.mxu2 }
 0x29f   : > { %v1053_v33 = vadd.f32 %v1295_v1, %v1052_v32 }
 0x2a1   : > { %1084 = vst.msk [vmem:[%s1723_s18 + $0x60] sm:$0xff] %vm1071_vm1, %v1053_v33  ;;  %v1067_v34 = vpop.f32.mrf.mxu3 }
 0x2a2   : > { %v1068_v35 = vadd.f32 %v1295_v1, %v1067_v34 }
 0x2a4   : > { %1090 = vst.msk [vmem:[%s1723_s18 + $0x90] sm:$0xff] %vm1071_vm1, %v1068_v35 }
 0x2a6   : > { %v1054_v36 = vpop.f32.mrf.mxu2 }
 0x2a7   : > { %v1055_v37 = vadd.f32 %v1295_v1, %v1054_v36 }
 0x2a9   : > { %1085 = vst.msk [vmem:[%s1723_s18 + $0x68] sm:$0xff] %vm1071_vm1, %v1055_v37  ;;  %v1069_v38 = vpop.f32.mrf.mxu3 }
 0x2ae   : > { %v1057_v39 = vpop.f32.mrf.mxu2 }
 0x2af   : > { %v1058_v40 = vadd.f32 %v1295_v1, %v1057_v39 }
 0x2b1   : > { %1086 = vst.msk [vmem:[%s1723_s18 + $0x70] sm:$0xff] %vm1071_vm1, %v1058_v40 }
 0x2b6   : > { %v1059_v41 = vpop.f32.mrf.mxu2 }
 0x2b7   : > { %v1060_v42 = vadd.f32 %v1295_v1, %v1059_v41 }
 0x2b9   : > { %1087 = vst.msk [vmem:[%s1723_s18 + $0x78] sm:$0xff] %vm1071_vm1, %v1060_v42 }
 0x2ba PF: > { %s19_s30 = sadd.s32 1, %s1416_s30  }
 0x2bb   : > { %p16_p4 = scmp.ge.s32.totalorder %s19_s30, 4  }
 0x2bd   :  { %18 = sbr.rel (!%p16_p4) target bundleno = 1 (0x1), region = 86 }

</bundles_post_ra>
